<compile_context>
chip_gen: v6e
topology: v6e:2x2x1
jax: 0.10.0
libtpu: 0.0.40
codegen_flags: <defaults>
</compile_context>

<pallas_src>
import functools

import jax
import jax.numpy as jnp
from jax.experimental import pallas as pl
from jax.experimental.pallas import tpu as pltpu

EPS = 1e-9
SUBLANE = 8


def _round_up(n, m):
    return (n + m - 1) // m * m


@functools.lru_cache(maxsize=None)
def _vmem_limit_bytes():
    """Generation-aware scoped-VMEM budget (v7x: 64 MiB cap, v5e/v6e: 128 MiB)."""
    try:
        cap = int(pltpu.get_tpu_info().vmem_capacity_bytes)
        return int(min((cap * 3) // 4, 100 * 1024 * 1024))
    except Exception:
        return 32 * 1024 * 1024  # known-safe default on every generation


def _pick_batch_tile(B, K, C, x_bytes, res_bytes, vmem_limit):
    """Largest batch tile whose double-buffered streams fit the VMEM budget."""
    resident = (2 * K * C + 2 * C) * 4 + 4          # wsq, wlin, c, logterm, margin
    per_row = K * x_bytes + C * res_bytes + 4       # streamed bytes per batch row
    avail = max(vmem_limit - resident - (2 << 20), 2 << 20)
    tb = max(SUBLANE, (avail // (2 * per_row)) // SUBLANE * SUBLANE)
    tb = min(tb, 4096)                              # step overhead already amortized
    b8 = _round_up(B, SUBLANE)
    if b8 >= 2 * SUBLANE:
        # keep >= 2 grid steps so "parallel" actually shards v7x's two TCs
        tb = min(tb, _round_up(-(-b8 // 2), SUBLANE))
    else:
        tb = min(tb, b8)
    return max(tb, SUBLANE)


def _sw_kernel(margin_ref, x_ref, wsq_ref, wlin_ref, c_ref, lt_ref, lab_ref,
               res_ref, mll_ref):
    """One batch tile.

    margin_ref : (1, 1)  f32 SMEM  margin (runtime scalar)
    x_ref      : (TB, K) f32/bf16  batch tile of features
    wsq_ref    : (K, C)  f32 VMEM  -0.5 / max(sigma, eps)       (resident)
    wlin_ref   : (K, C)  f32 VMEM  mu / max(sigma, eps)          (resident)
    c_ref      : (1, C)  f32 VMEM  -0.5 * sum_k mu^2 / s         (resident)
    lt_ref     : (1, C)  f32 VMEM  log(max(det^-0.5, eps))       (resident)
    lab_ref    : (TB, 1) i32 VMEM  labels
    res_ref    : (TB, C)           res output (input dtype)
    mll_ref    : (TB, 1) f32       per-sample max-likelihood loss
    """
    margin = margin_ref[0, 0]
    xf = x_ref[...].astype(jnp.float32)

    # pro[b,c] = -0.5 * sum_k (x[b,k] - mu[k,c])^2 / max(sigma[k,c], eps)
    # expanded into two MXU dots against resident weights (no lane concat).
    e = jnp.dot(xf * xf, wsq_ref[...], preferred_element_type=jnp.float32)
    e = e + jnp.dot(xf, wlin_ref[...], preferred_element_type=jnp.float32)
    e = e + c_ref[...]

    tb, c = res_ref.shape
    col = jax.lax.broadcasted_iota(jnp.int32, (tb, c), 1)
    onehot = col == lab_ref[...]                                   # (TB, C)

    lt = lt_ref[...]                                               # (1, C)
    # margin boost on the label column (pro[label] += margin * pro[label])
    res = jnp.where(onehot, e * (1.0 + margin), e) + lt
    res_ref[...] = res.astype(res_ref.dtype)
    # per-sample loss = 0.5 * D[label] - logterm[label] = -(e + lt)[label]
    mll_ref[...] = jnp.sum(jnp.where(onehot, -(e + lt), 0.0), axis=1,
                           keepdims=True)


@jax.jit
def sw_forward(x, label, mu, sigma, margin, likehood_coef):
    B, K = x.shape
    K2, C = mu.shape
    assert K == K2

    if x.dtype not in (jnp.dtype(jnp.bfloat16), jnp.dtype(jnp.float32)):
        x = x.astype(jnp.float32)
    x_bytes = jnp.dtype(x.dtype).itemsize
    res_dtype = x.dtype

    # ---- per-class preprocessing: O(K*C), once per call ----
    sigma32 = sigma.astype(jnp.float32)
    mu32 = mu.astype(jnp.float32)
    inv_s = 1.0 / jnp.maximum(sigma32, EPS)
    w_sq = -0.5 * inv_s                                                   # (K, C)
    w_lin = mu32 * inv_s                                                  # (K, C)
    c_neg = -0.5 * jnp.sum(mu32 * mu32 * inv_s, axis=0, keepdims=True)    # (1, C)
    # log(max(det^-0.5, eps)), det = prod_k sigma (sigma > 0), via a log-sum.
    logterm = jnp.maximum(
        -0.5 * jnp.sum(jnp.log(sigma32), axis=0, keepdims=True),
        jnp.log(jnp.float32(EPS)))                                        # (1, C)

    vmem_limit = _vmem_limit_bytes()
    tb = _pick_batch_tile(B, K, C, x_bytes, jnp.dtype(res_dtype).itemsize,
                          vmem_limit)
    b_pad = _round_up(B, tb)

    lab2 = label.astype(jnp.int32).reshape(B, 1)
    if b_pad != B:
        x_in = jnp.pad(x, ((0, b_pad - B), (0, 0)))
        lab_in = jnp.pad(lab2, ((0, b_pad - B), (0, 0)))
    else:
        x_in, lab_in = x, lab2

    margin2d = jnp.asarray(margin, jnp.float32).reshape(1, 1)

    res_pad, mll_pad = pl.pallas_call(
        _sw_kernel,
        grid=(b_pad // tb,),
        in_specs=[
            pl.BlockSpec(memory_space=pltpu.MemorySpace.SMEM),   # margin
            pl.BlockSpec((tb, K), lambda i: (i, 0)),             # x tile
            pl.BlockSpec((K, C), lambda i: (0, 0)),              # w_sq (resident)
            pl.BlockSpec((K, C), lambda i: (0, 0)),              # w_lin (resident)
            pl.BlockSpec((1, C), lambda i: (0, 0)),              # c_neg (resident)
            pl.BlockSpec((1, C), lambda i: (0, 0)),              # logterm (resident)
            pl.BlockSpec((tb, 1), lambda i: (i, 0)),             # label tile
        ],
        out_specs=(
            pl.BlockSpec((tb, C), lambda i: (i, 0)),             # res (unpadded C)
            pl.BlockSpec((tb, 1), lambda i: (i, 0)),             # per-sample loss
        ),
        out_shape=(
            jax.ShapeDtypeStruct((b_pad, C), res_dtype),
            jax.ShapeDtypeStruct((b_pad, 1), jnp.float32),
        ),
        compiler_params=pltpu.CompilerParams(
            dimension_semantics=("parallel",),
            vmem_limit_bytes=vmem_limit,
        ),
    )(margin2d, x_in, w_sq, w_lin, c_neg, logterm, lab_in)

    res = res_pad if b_pad == B else res_pad[:B]
    max_likehood_loss = likehood_coef * jnp.mean(mll_pad[:B, 0])
    return res, max_likehood_loss
    # TODO(synk): for num_classes in the thousands, add a class-tile grid axis
    # so the per-class weights stream instead of staying VMEM-resident (v7x).


class SWLayer:
    """Python-side stateful wrapper mirroring SW_layer.__init__/forward."""

    def __init__(self, bit, margin, gamma, step, maxx, likehood_coef,
                 num_classes, mu, sigma):
        self.margin = float(margin)
        self.gamma = gamma
        self.maxx = maxx
        self.step = step
        self.likehood_coef = likehood_coef
        self.mu = mu          # (bit, num_classes)
        self.sigma = sigma    # (bit, num_classes), non-trainable
        self.cnt = 0

    def __call__(self, x, label):
        # margin schedule (host-side module state, like the torch counter);
        # margin is a runtime scalar, so no recompile when it changes.
        # TODO(synk): the torch module prints the new margin; omitted here.
        self.cnt += 1
        if self.cnt % self.step == self.step - 1:
            self.margin = min(self.margin * self.gamma, self.maxx)
        return sw_forward(x, label, self.mu, self.sigma,
                          jnp.float32(self.margin),
                          jnp.float32(self.likehood_coef))


def _reference(x, label, mu, sigma, margin, coef):
    """Pure-JAX transcription of the torch forward, for validation."""
    mu_sel = mu[:, label].T
    sig_sel = jnp.maximum(sigma[:, label].T, EPS)
    mll = 0.5 * jnp.sum((x - mu_sel) ** 2 / sig_sel, axis=1)
    mll = mll - jnp.log(jnp.maximum(jnp.prod(sigma[:, label], axis=0) ** (-0.5), EPS))
    mll = coef * jnp.mean(mll)

    d = jnp.sum((x[:, :, None] - mu[None]) ** 2 / jnp.maximum(sigma, EPS)[None], axis=1)
    pro = -0.5 * d
    onehot = jax.nn.one_hot(label, mu.shape[1], dtype=bool)
    pro = jnp.where(onehot, pro * (1.0 + margin), pro)
    det = jnp.prod(sigma, axis=0)
    res = pro + jnp.log(jnp.maximum(det ** (-0.5), EPS))
    return res, mll


if __name__ == "__main__":
    bit, num_classes, batch = 32, 16, 8

    key = jax.random.PRNGKey(0)
    k1, k2, k3, k4 = jax.random.split(key, 4)
    x = jax.random.normal(k1, (batch, bit), jnp.float32)
    label = jax.random.randint(k2, (batch,), 0, num_classes, dtype=jnp.int32)
    mu = 0.5 * jax.random.normal(k3, (bit, num_classes), jnp.float32)
    sigma = jax.random.uniform(k4, (bit, num_classes), jnp.float32,
                               minval=0.5, maxval=1.5)

    layer = SWLayer(bit=bit, margin=0.1, gamma=1.1, step=10, maxx=0.5,
                    likehood_coef=0.01, num_classes=num_classes,
                    mu=mu, sigma=sigma)

    res, loss = layer(x, label)
    res, loss = jax.block_until_ready((res, loss))

    res_ref, loss_ref = _reference(x, label, mu, sigma,
                                   margin=layer.margin,
                                   coef=layer.likehood_coef)
    assert jnp.allclose(res, res_ref, rtol=1e-4, atol=1e-3), "res mismatch"
    assert jnp.allclose(loss, loss_ref, rtol=1e-4, atol=5e-4), "loss mismatch"

    print("KERNEL_OK")
</pallas_src>

<mosaic_0001>
module attributes {stable_mosaic.version = 11 : i64} {
  func.func @_sw_kernel(%arg0: i32, %arg1: memref<1x1xf32, #tpu.memory_space<smem>>, %arg2: memref<8x32xf32, #tpu.memory_space<vmem>>, %arg3: memref<32x16xf32, #tpu.memory_space<vmem>>, %arg4: memref<32x16xf32, #tpu.memory_space<vmem>>, %arg5: memref<1x16xf32, #tpu.memory_space<vmem>>, %arg6: memref<1x16xf32, #tpu.memory_space<vmem>>, %arg7: memref<8x1xi32, #tpu.memory_space<vmem>>, %arg8: memref<8x16xf32, #tpu.memory_space<vmem>>, %arg9: memref<8x1xf32, #tpu.memory_space<vmem>>) attributes {dimension_semantics = [#tpu.dimension_semantics<parallel>], iteration_bounds = array<i64: 1>, scalar_prefetch = 0 : i64, scratch_operands = 0 : i64, tpu.core_type = #tpu.core_type<tc>, window_params = [{transform_indices = @transform_0, window_bounds = array<i64: 1, 1>}, {transform_indices = @transform_1, window_bounds = array<i64: 8, 32>}, {pipeline_mode = #tpu.pipeline_mode<synchronous>, transform_indices = @transform_2, window_bounds = array<i64: 32, 16>}, {pipeline_mode = #tpu.pipeline_mode<synchronous>, transform_indices = @transform_3, window_bounds = array<i64: 32, 16>}, {pipeline_mode = #tpu.pipeline_mode<synchronous>, transform_indices = @transform_4, window_bounds = array<i64: 1, 16>}, {pipeline_mode = #tpu.pipeline_mode<synchronous>, transform_indices = @transform_5, window_bounds = array<i64: 1, 16>}, {transform_indices = @transform_6, window_bounds = array<i64: 8, 1>}, {transform_indices = @transform_7, window_bounds = array<i64: 8, 16>}, {transform_indices = @transform_8, window_bounds = array<i64: 8, 1>}]} {
    %c0 = arith.constant 0 : index
    %c0_0 = arith.constant 0 : index
    %0 = memref.load %arg1[%c0, %c0_0] : memref<1x1xf32, #tpu.memory_space<smem>>
    %c0_1 = arith.constant 0 : index
    %c0_2 = arith.constant 0 : index
    %1 = vector.load %arg2[%c0_1, %c0_2] : memref<8x32xf32, #tpu.memory_space<vmem>>, vector<8x32xf32>
    %2 = arith.mulf %1, %1 : vector<8x32xf32>
    %c0_3 = arith.constant 0 : index
    %c0_4 = arith.constant 0 : index
    %3 = vector.load %arg3[%c0_3, %c0_4] : memref<32x16xf32, #tpu.memory_space<vmem>>, vector<32x16xf32>
    %cst = arith.constant dense<0.000000e+00> : vector<8x16xf32>
    %4 = tpu.matmul %2, %3, %cst {dimension_numbers = #tpu.dot_dimension_numbers<[1], [0], [0], [1], [0, 0, 1, 1], [], []>} : vector<8x32xf32>, vector<32x16xf32>, vector<8x16xf32> -> vector<8x16xf32>
    %c0_5 = arith.constant 0 : index
    %c0_6 = arith.constant 0 : index
    %5 = vector.load %arg4[%c0_5, %c0_6] : memref<32x16xf32, #tpu.memory_space<vmem>>, vector<32x16xf32>
    %cst_7 = arith.constant dense<0.000000e+00> : vector<8x16xf32>
    %6 = tpu.matmul %1, %5, %cst_7 {dimension_numbers = #tpu.dot_dimension_numbers<[1], [0], [0], [1], [0, 0, 1, 1], [], []>} : vector<8x32xf32>, vector<32x16xf32>, vector<8x16xf32> -> vector<8x16xf32>
    %7 = arith.addf %4, %6 : vector<8x16xf32>
    %c0_8 = arith.constant 0 : index
    %c0_9 = arith.constant 0 : index
    %8 = vector.load %arg5[%c0_8, %c0_9] : memref<1x16xf32, #tpu.memory_space<vmem>>, vector<1x16xf32>
    %9 = vector.broadcast %8 : vector<1x16xf32> to vector<8x16xf32>
    %10 = arith.addf %7, %9 : vector<8x16xf32>
    %11 = tpu.iota {dimensions = array<i32: 1>} : vector<8x16xi32>
    %c0_10 = arith.constant 0 : index
    %c0_11 = arith.constant 0 : index
    %12 = vector.load %arg7[%c0_10, %c0_11] : memref<8x1xi32, #tpu.memory_space<vmem>>, vector<8x1xi32>
    %13 = vector.broadcast %12 : vector<8x1xi32> to vector<8x16xi32>
    %14 = arith.cmpi eq, %11, %13 : vector<8x16xi32>
    %c0_12 = arith.constant 0 : index
    %c0_13 = arith.constant 0 : index
    %15 = vector.load %arg6[%c0_12, %c0_13] : memref<1x16xf32, #tpu.memory_space<vmem>>, vector<1x16xf32>
    %cst_14 = arith.constant 1.000000e+00 : f32
    %16 = arith.addf %cst_14, %0 : f32
    %17 = vector.broadcast %16 : f32 to vector<8x16xf32>
    %18 = arith.mulf %10, %17 : vector<8x16xf32>
    %19 = arith.select %14, %18, %10 : vector<8x16xi1>, vector<8x16xf32>
    %20 = vector.broadcast %15 : vector<1x16xf32> to vector<8x16xf32>
    %21 = arith.addf %19, %20 : vector<8x16xf32>
    %c0_15 = arith.constant 0 : index
    %c0_16 = arith.constant 0 : index
    %22 = vector.load %arg8[%c0_15, %c0_16] : memref<8x16xf32, #tpu.memory_space<vmem>>, vector<8x16xf32>
    tpu.vector_store %arg8[%c0_15, %c0_16], %21 {strides = array<i32>} : memref<8x16xf32, #tpu.memory_space<vmem>>, vector<8x16xf32>,
    %23 = vector.broadcast %15 : vector<1x16xf32> to vector<8x16xf32>
    %24 = arith.addf %10, %23 : vector<8x16xf32>
    %cst_17 = arith.constant 0.000000e+00 : f32
    %25 = vector.broadcast %cst_17 : f32 to vector<8x16xf32>
    %26 = arith.subf %25, %24 : vector<8x16xf32>
    %cst_18 = arith.constant 0.000000e+00 : f32
    %27 = vector.broadcast %cst_18 : f32 to vector<8x16xf32>
    %28 = arith.select %14, %26, %27 : vector<8x16xi1>, vector<8x16xf32>
    %cst_19 = arith.constant dense<0.000000e+00> : vector<8xf32>
    %29 = vector.multi_reduction <add>, %28, %cst_19 [1] : vector<8x16xf32> to vector<8xf32>
    %30 = vector.shape_cast %29 : vector<8xf32> to vector<8x1xf32>
    %c0_20 = arith.constant 0 : index
    %c0_21 = arith.constant 0 : index
    %31 = vector.load %arg9[%c0_20, %c0_21] : memref<8x1xf32, #tpu.memory_space<vmem>>, vector<8x1xf32>
    tpu.vector_store %arg9[%c0_20, %c0_21], %30 {strides = array<i32>} : memref<8x1xf32, #tpu.memory_space<vmem>>, vector<8x1xf32>,
    return
  }
  func.func @transform_0(%arg0: i32) -> (i32, i32) {
    %c0_i32 = arith.constant 0 : i32
    %c0_i32_0 = arith.constant 0 : i32
    %c0_i32_1 = arith.constant 0 : i32
    return %c0_i32, %c0_i32_0 : i32, i32
  }
  func.func @transform_1(%arg0: i32) -> (i32, i32) {
    %c0_i32 = arith.constant 0 : i32
    %c0_i32_0 = arith.constant 0 : i32
    return %arg0, %c0_i32 : i32, i32
  }
  func.func @transform_2(%arg0: i32) -> (i32, i32) {
    %c0_i32 = arith.constant 0 : i32
    %c0_i32_0 = arith.constant 0 : i32
    %c0_i32_1 = arith.constant 0 : i32
    return %c0_i32, %c0_i32_0 : i32, i32
  }
  func.func @transform_3(%arg0: i32) -> (i32, i32) {
    %c0_i32 = arith.constant 0 : i32
    %c0_i32_0 = arith.constant 0 : i32
    %c0_i32_1 = arith.constant 0 : i32
    return %c0_i32, %c0_i32_0 : i32, i32
  }
  func.func @transform_4(%arg0: i32) -> (i32, i32) {
    %c0_i32 = arith.constant 0 : i32
    %c0_i32_0 = arith.constant 0 : i32
    %c0_i32_1 = arith.constant 0 : i32
    return %c0_i32, %c0_i32_0 : i32, i32
  }
  func.func @transform_5(%arg0: i32) -> (i32, i32) {
    %c0_i32 = arith.constant 0 : i32
    %c0_i32_0 = arith.constant 0 : i32
    %c0_i32_1 = arith.constant 0 : i32
    return %c0_i32, %c0_i32_0 : i32, i32
  }
  func.func @transform_6(%arg0: i32) -> (i32, i32) {
    %c0_i32 = arith.constant 0 : i32
    %c0_i32_0 = arith.constant 0 : i32
    return %arg0, %c0_i32 : i32, i32
  }
  func.func @transform_7(%arg0: i32) -> (i32, i32) {
    %c0_i32 = arith.constant 0 : i32
    %c0_i32_0 = arith.constant 0 : i32
    return %arg0, %c0_i32 : i32, i32
  }
  func.func @transform_8(%arg0: i32) -> (i32, i32) {
    %c0_i32 = arith.constant 0 : i32
    %c0_i32_0 = arith.constant 0 : i32
    return %arg0, %c0_i32 : i32, i32
  }
}

</mosaic_0001>

<bundles_post_ra>
// kernel: sw_forward.1
= control target key start
LH: loop header
LB: loop body
LE: loop exit
PB: predicated region body
PF: predicated region fallthrough
CT: control target
= control target key end

     0   :  { %v306_v2 = vmov 0.0   ;;  %s400_s0 = inlined_call_operand.<no memory space> [shape: f32[1,1], index: 0, kind: input, shape index: {}]   ;;  %s401_s1 = inlined_call_operand.vmem [shape: f32[8,32], index: 1, kind: input, shape index: {}]   ;;  %s402_s2 = inlined_call_operand.vmem [shape: f32[32,16], index: 2, kind: input, shape index: {}]   ;;  %s403_s3 = inlined_call_operand.vmem [shape: f32[32,16], index: 3, kind: input, shape index: {}]   ;;  %s404_s4 = inlined_call_operand.vmem [shape: f32[1,16], index: 4, kind: input, shape index: {}]   ;;  %s405_s5 = inlined_call_operand.vmem [shape: f32[1,16], index: 5, kind: input, shape index: {}]   ;;  %s406_s6 = inlined_call_operand.vmem [shape: s32[8,1], index: 6, kind: input, shape index: {}]   ;;  %s407_s7 = inlined_call_operand.hbm [shape: f32[8,16], index: 7, kind: output, shape index: {0}]   ;;  %s408_s8 = inlined_call_operand.vmem [shape: f32[8,1], index: 8, kind: output, shape index: {1}]  }
   0x1   :  { %v40_v0 = vld [vmem:[%s403_s3 + $0x18] sm:$0xff]  ;;  %257 = vmatprep.subr.mxu0 %v306_v2  ;;  %268 = vmatprep.subr.mxu1 %v306_v2  ;;  %v39_v3 = vld [vmem:[%s403_s3 + $0x10] sm:$0xff]  ;;  %v38_v5 = vld [vmem:[%s403_s3 + $0x8] sm:$0xff] }
   0x2   :  { %v36_v1 = vld [vmem:[%s402_s2 + $0x18] sm:$0xff]  ;;  %v35_v4 = vld [vmem:[%s402_s2 + $0x10] sm:$0xff]  ;;  %258 = vmatpush3.msra.mxu0 %v40_v0  ;;  %v34_v6 = vld [vmem:[%s402_s2 + $0x8] sm:$0xff] }
   0x3   :  { %269 = vmatpush3.msra.mxu1 %v36_v1  ;;  %259 = vmatprep.subr.mxu0 %v306_v2  ;;  %v31_v7 = vld [vmem:[%s401_s1] sm:$0xff] }
   0x4   :  { %270 = vmatprep.subr.mxu1 %v306_v2 }
   0x5   :  { %15 = vsyncpa [#allocation4], 0  ;;  %260 = vmatpush3.msra.mxu0 %v39_v3  ;;  %271 = vmatpush3.msra.mxu1 %v35_v4  ;;  %v37_v8 = vld [vmem:[%s403_s3] sm:$0xff]  ;;  %v32_v10 = vmul.f32 %v31_v7, %v31_v7  ;;  %vm41_vm0 = vcmask 261120   ;;  %vm307_vm1 = vmmov 0   ;;  %v308_v12 = vmov 0  }
   0x6   :  { %261 = vmatprep.subr.mxu0 %v306_v2  ;;  %272 = vmatprep.subr.mxu1 %v306_v2  ;;  %v33_v9 = vld [vmem:[%s402_s2] sm:$0xff]  ;;  %v196_v13 = vlaneseq  ;;  %s204_s24 = sadd.f32 1.0, %s400_s0  ;;  %vm215_vm3 = vcmask 130048   ;;  %s309_s0 = smov [#allocation3]  }
   0x7   :  { %262 = vmatpush3.msra.mxu0 %v38_v5  ;;  %273 = vmatpush3.msra.mxu1 %v34_v6  ;;  %v198_v11 = vld [vmem:[%s406_s6] sm:$0xff] }
   0x8   :  { %263 = vmatprep.subr.mxu0 %v306_v2  ;;  %274 = vmatprep.subr.mxu1 %v306_v2  ;;  %v245_v16 = vld [vmem:[%s404_s4] ss:$0 sm:$0xff]  ;;  %v197_v17 = vand.u32 127, %v196_v13  ;;  %v205_v20 = vstv %s204_s24  ;;  %s231_s4 = sshll.u32 %s309_s0, 4  ;;  %s232_s4 = int_to_ptr.vmem [resolvable:$true] %s231_s4 }
   0x9   :  { %264 = vmatpush3.msra.mxu0 %v37_v8  ;;  %265 = vmatprep.mubr.msk.f32.mxu0 %vm307_vm1, %v306_v2  ;;  %v246_v23 = vld [vmem:[%s405_s5] ss:$0 sm:$0xff]  ;;  %s284_s28 = scalar_lea.vmem %s232_s4, 128  ;;  %p289_p1 = scmp.lt.s32.totalorder %s232_s4, %s232_s4 }
   0xa   :  { %275 = vmatpush3.msra.mxu1 %v33_v9  ;;  %276 = vmatprep.mubr.msk.f32.mxu1 %vm307_vm1, %v306_v2  ;;  %p285_p0 = scmp.ne.s32.totalorder %s232_s4, %s284_s28  ;;  %p290_p2 = scmp.lt.s32.totalorder %s284_s28, %s284_s28 }
   0xb   :  { %266 = vmatmul.mubr.msk.f32.vlgmr.msra.gmra.mxu0 %vm41_vm0, %v31_v7  ;;  %277 = vmatmul.mubr.msk.f32.vlgmr.msra.gmra.mxu1 %vm41_vm0, %v32_v10 }
   0xc   :  { %283 = vset.pattern.permute.xlu0 %v308_v12  ;;  %p291_p3 = por %p290_p2, %p289_p1 }
   0xd   :  { %200 = vperm.xlu0 %283, %v198_v11  }
   0xe   :  { %p292_p4 = pnand %p291_p3, %p285_p0 }
  0x88   :  { %v201_v19 = vpop.permute.xlu0 %200 }
  0x89   :  { %vm202_vm2 = vcmp.eq.s32.totalorder %v197_v17, %v201_v19 }
  0xcb   :  { %v111_v14 = vpop.f32.mrf.mxu0  ;;  %v184_v15 = vpop.f32.mrf.mxu1 }
  0xcc   :  { %v185_v18 = vadd.f32 %v184_v15, %v111_v14 }
  0xcd   :  { %v267_v21 = vpop.f32.mrf.mxu0  ;;  %v278_v22 = vpop.f32.mrf.mxu1 }
  0xce   :  { %v195_v24 = vadd.f32 %v245_v16, %v185_v18 }
  0xd0   :  { %v206_v25 = vmul.f32 %v205_v20, %v195_v24  ;;  %v217_v26 = vadd.f32 %v246_v23, %v195_v24 }
  0xd2   :  { %v207_v27 = vsel %vm202_vm2, %v206_v25, %v195_v24  ;;  %v218_v28 = vsub.f32 0.0, %v217_v26 }
  0xd3   :  { %v214_v29 = vadd.f32 %v246_v23, %v207_v27 }
  0xd4   :  { %v219_v30 = vsel %vm202_vm2, %v218_v28, 0.0 }
  0xd5   :  { %v220_v31 = vsel %vm215_vm3, %v219_v30, 0.0  ;;  %216 = vst.msk [vmem:[#allocation3] sm:$0xff] %vm215_vm3, %v214_v29 }
  0xd6   :  { %221 = vadd.xlane.f32.xlu0 %v220_v31 }
  0xd7   :  { %295 = shalt.err (!%p292_p4)
}
  0xd8   :  { %234 = dma.vmem_to_hbm [thread:$0]  %s232_s4, 128, %s407_s7, [#allocation4]   ;;  %vm223_vm4 = vcmask 7168  }
 0x15f   :  { %v222_v32 = vpop.xlane.xlu0 %221 }
 0x160   :  { %224 = vst.msk [vmem:[%s408_s8] sm:$0xff] %vm223_vm4, %v222_v32 }
 0x161   :  { %304 = dma.done.wait [#allocation4], 128  }
 0x162   :  { %305 = vsyncadd [#allocation4], 4294967168 }
 0x163   :  { %242 = vsyncpa [#allocation4], 1 }

</bundles_post_ra>
